<compile_context>
chip_gen: v7x
topology: tpu7x:2x2x1
jax: 0.10.0
libtpu: 0.0.40
codegen_flags: <defaults>
</compile_context>

<pallas_src>
import functools

import jax
import jax.numpy as jnp
from jax import lax
from jax.experimental import pallas as pl
from jax.experimental.pallas import tpu as pltpu


LANES = 512            # lane-dense width for the attention stream (mult. of 128)
_DEF_TILE_ROWS = 1024  # default sublane extent of one attention tile
_NCORES = 2            # leading "parallel" grid axis (v7x megacore split)


def _round_up(x, m):
    return (x + m - 1) // m * m


def _softmax_xent(logits_ref, labels_ref):
    """Mean softmax cross-entropy (nn.CrossEntropyLoss default reduction)."""
    logits = logits_ref[...].astype(jnp.float32)           # (B, C)
    labels = labels_ref[...]                                # (B, 1) int32
    b, c = logits.shape
    m = jnp.max(logits, axis=-1, keepdims=True)
    lse = jnp.log(jnp.sum(jnp.exp(logits - m), axis=-1, keepdims=True)) + m
    cls = lax.broadcasted_iota(jnp.int32, (b, c), 1)
    correct = jnp.sum(jnp.where(cls == labels, logits, 0.0),
                      axis=-1, keepdims=True)
    return jnp.mean(lse - correct)


def _ce_only_kernel(logits_ref, labels_ref, out_ref):
    """layer=None fast path: Latt is identically 0, so only CE is needed."""
    out_ref[0] = _softmax_xent(logits_ref, labels_ref)


def _arvit_loss_kernel(bias, logits_ref, labels_ref, s_ref, p_ref,
                       ce_ref, att_ref, acc_ref):
    """Gridded kernel: grid = (core, step).

    Per core: CE once (step==0), streaming accumulation of s*(p+bias) into an
    f32 VMEM scratch tile every step, single scalar reduce at the last step.
    """
    step = pl.program_id(1)

    @pl.when(step == 0)
    def _():
        ce = _softmax_xent(logits_ref, labels_ref)
        ce_ref[...] = jnp.full(ce_ref.shape, ce, dtype=jnp.float32)
        acc_ref[...] = jnp.zeros_like(acc_ref)

    # Cast in-vreg (inputs stream in their native dtype); pure VALU per step.
    s = s_ref[...].astype(jnp.float32)
    p = p_ref[...].astype(jnp.float32)
    acc_ref[...] += s * (p + bias)

    # One cross-lane (XLU) reduce per core, only at the very end.
    @pl.when(step == pl.num_programs(1) - 1)
    def _():
        att_ref[...] = jnp.full(att_ref.shape, jnp.sum(acc_ref[...]),
                                dtype=jnp.float32)


def arvit_loss(logits, labels, sattn_layers, pattn, *, bias=-0.17,
               lambda_=0.01, layer=None, tile_rows=_DEF_TILE_ROWS,
               ncores=_NCORES):
    """JAX wrapper matching ARViT_Loss.forward(preds, label) where
       preds[0]=logits, preds[1]=sattn_layers (per-layer attn), preds[3]=pattn."""
    B, C = logits.shape
    labels2 = labels.astype(jnp.int32).reshape(B, 1)

    if layer is None:
        # Latt == 0.0 identically: CE-only kernel, no attention streaming.
        out = pl.pallas_call(
            _ce_only_kernel,
            out_shape=jax.ShapeDtypeStruct((1,), jnp.float32),
            in_specs=[pl.BlockSpec(memory_space=pltpu.MemorySpace.VMEM)] * 2,
            out_specs=pl.BlockSpec(memory_space=pltpu.MemorySpace.SMEM),
        )(logits, labels2)
        return out[0]

    sattn_l = sattn_layers[layer]

    # --- lane-dense layout glue: flatten and reshape to (rows_padded, LANES).
    # Zero padding is exact: padded sattn entries are 0 -> 0*(0+bias) == 0.
    total = int(sattn_l.size)
    rows_needed = pl.cdiv(total, LANES)
    tile_rows = max(32, _round_up(int(tile_rows), 32))         # dtype-safe sublanes
    tile_rows_eff = min(tile_rows, _round_up(pl.cdiv(rows_needed, ncores), 32))
    steps = pl.cdiv(rows_needed, ncores * tile_rows_eff)
    rows_padded = ncores * steps * tile_rows_eff
    pad = rows_padded * LANES - total

    def _prep(x):
        flat = x.reshape(-1)                 # native dtype, no f32 pre-cast
        if pad:
            flat = jnp.pad(flat, (0, pad))
        return flat.reshape(rows_padded, LANES)

    s2 = _prep(sattn_l)
    p2 = _prep(pattn)

    # VMEM budget: 2 inputs x 2 pipeline buffers x tile + f32 accumulator + slack.
    itm = jnp.dtype(s2.dtype).itemsize + jnp.dtype(p2.dtype).itemsize
    vmem_need = (2 * tile_rows_eff * LANES * itm
                 + 4 * tile_rows_eff * LANES
                 + (2 << 20))
    vmem_limit = int(min(112 << 20, max(32 << 20, vmem_need)))

    kernel = functools.partial(_arvit_loss_kernel, float(bias))

    ce_out, att_out = pl.pallas_call(
        kernel,
        out_shape=(jax.ShapeDtypeStruct((ncores * 8, 128), jnp.float32),
                   jax.ShapeDtypeStruct((ncores * 8, 128), jnp.float32)),
        grid_spec=pltpu.PrefetchScalarGridSpec(
            num_scalar_prefetch=0,
            grid=(ncores, steps),
            in_specs=[
                # logits / labels: constant block index -> resident across grid.
                pl.BlockSpec((B, C), lambda c, s: (0, 0)),
                pl.BlockSpec((B, 1), lambda c, s: (0, 0)),
                # attention streams: each core walks its own contiguous rows.
                pl.BlockSpec((tile_rows_eff, LANES),
                             lambda c, s: (c * steps + s, 0)),
                pl.BlockSpec((tile_rows_eff, LANES),
                             lambda c, s: (c * steps + s, 0)),
            ],
            out_specs=[
                pl.BlockSpec((8, 128), lambda c, s: (c, 0)),
                pl.BlockSpec((8, 128), lambda c, s: (c, 0)),
            ],
            scratch_shapes=[pltpu.VMEM((tile_rows_eff, LANES), jnp.float32)],
        ),
        compiler_params=pltpu.CompilerParams(
            dimension_semantics=("parallel", "arbitrary"),
            vmem_limit_bytes=vmem_limit),
    )(logits, labels2, s2, p2)

    # Tiny cross-core scalar combine (clamp-to-1 / log / lambda mix) in the
    # wrapper: O(ncores) scalars, negligible next to the streamed reduction.
    ce = ce_out[0, 0]
    att = jnp.sum(att_out[::8, 0])           # one partial per core block
    att = jnp.where(att <= 1.0, jnp.float32(1.0), att)
    return ce + jnp.float32(lambda_) * jnp.log(att)


if __name__ == "__main__":
    key = jax.random.PRNGKey(0)
    bias, lambda_ = -0.17, 0.01

    def reference(logits, labels, sattn_layers, pattn, layer):
        lg = logits.astype(jnp.float32)
        lse = jax.scipy.special.logsumexp(lg, axis=-1)
        ce = jnp.mean(lse - lg[jnp.arange(lg.shape[0]), labels])
        if layer is None:
            return ce
        att = jnp.sum(sattn_layers[layer].astype(jnp.float32)
                      * (pattn.astype(jnp.float32) + bias))
        att = jnp.where(att <= 1.0, 1.0, att)
        return ce + lambda_ * jnp.log(att)

    # --- Case 1: small single-step problem (f32 attention maps), layer=1.
    B, C, L, H, N = 2, 10, 3, 4, 8
    k1, k2, k3, k4 = jax.random.split(key, 4)
    logits = jax.random.normal(k1, (B, C), dtype=jnp.float32)            # preds[0]
    labels = jax.random.randint(k2, (B,), 0, C)                          # label
    sattn = jax.nn.softmax(                                              # preds[1]
        jax.random.normal(k3, (L, B, H, N, N), dtype=jnp.float32), axis=-1)
    pattn = jax.random.uniform(k4, (B, H, N, N), dtype=jnp.float32)      # preds[3]

    out1 = jax.block_until_ready(
        arvit_loss(logits, labels, sattn, pattn,
                   bias=bias, lambda_=lambda_, layer=1))
    ref1 = reference(logits, labels, sattn, pattn, 1)
    assert jnp.allclose(out1, ref1, rtol=1e-5, atol=1e-5), (out1, ref1)

    # --- Case 2: bf16 attention maps streamed in native dtype; small tile_rows
    # forces a multi-step grid so the accumulator / pl.when paths are exercised.
    N2 = 72
    k5, k6 = jax.random.split(k4)
    sattn2 = jax.nn.softmax(
        jax.random.normal(k5, (L, B, H, N2, N2), dtype=jnp.float32),
        axis=-1).astype(jnp.bfloat16)
    pattn2 = jax.random.uniform(k6, (B, H, N2, N2),
                                dtype=jnp.float32).astype(jnp.bfloat16)
    out2 = jax.block_until_ready(
        arvit_loss(logits, labels, sattn2, pattn2,
                   bias=bias, lambda_=lambda_, layer=0, tile_rows=32))
    ref2 = reference(logits, labels, sattn2, pattn2, 0)
    assert jnp.allclose(out2, ref2, rtol=1e-3, atol=1e-3), (out2, ref2)

    # --- Case 3: layer=None -> CE-only fast path (no attention streaming).
    out3 = jax.block_until_ready(
        arvit_loss(logits, labels, sattn, pattn,
                   bias=bias, lambda_=lambda_, layer=None))
    ref3 = reference(logits, labels, sattn, pattn, None)
    assert jnp.allclose(out3, ref3, rtol=1e-5, atol=1e-5), (out3, ref3)

    print("KERNEL_OK")
</pallas_src>

<mosaic_0001>
module attributes {stable_mosaic.version = 11 : i64} {
  func.func @_arvit_loss_kernel(%arg0: i32, %arg1: i32, %arg2: memref<2x10xf32, #tpu.memory_space<vmem>>, %arg3: memref<2x1xi32, #tpu.memory_space<vmem>>, %arg4: memref<32x512xf32, #tpu.memory_space<vmem>>, %arg5: memref<32x512xf32, #tpu.memory_space<vmem>>, %arg6: memref<8x128xf32, #tpu.memory_space<vmem>>, %arg7: memref<8x128xf32, #tpu.memory_space<vmem>>, %arg8: memref<32x512xf32, #tpu.memory_space<vmem>>) attributes {dimension_semantics = [#tpu.dimension_semantics<parallel>, #tpu.dimension_semantics<arbitrary>], iteration_bounds = array<i64: 2, 1>, scalar_prefetch = 0 : i64, scratch_operands = 1 : i64, tpu.core_type = #tpu.core_type<tc>, window_params = [{pipeline_mode = #tpu.pipeline_mode<synchronous>, transform_indices = @transform_0, window_bounds = array<i64: 2, 10>}, {pipeline_mode = #tpu.pipeline_mode<synchronous>, transform_indices = @transform_1, window_bounds = array<i64: 2, 1>}, {transform_indices = @transform_2, window_bounds = array<i64: 32, 512>}, {transform_indices = @transform_3, window_bounds = array<i64: 32, 512>}, {transform_indices = @transform_4, window_bounds = array<i64: 8, 128>}, {transform_indices = @transform_5, window_bounds = array<i64: 8, 128>}]} {
    %c0_i32 = arith.constant 0 : i32
    %0 = arith.cmpi eq, %arg1, %c0_i32 : i32
    %1 = arith.extui %0 : i1 to i32
    %c0_i32_0 = arith.constant 0 : i32
    %2 = arith.cmpi ne, %1, %c0_i32_0 : i32
    scf.if %2 {
      %c0_10 = arith.constant 0 : index
      %c0_11 = arith.constant 0 : index
      %14 = vector.load %arg2[%c0_10, %c0_11] : memref<2x10xf32, #tpu.memory_space<vmem>>, vector<2x10xf32>
      %c0_12 = arith.constant 0 : index
      %c0_13 = arith.constant 0 : index
      %15 = vector.load %arg3[%c0_12, %c0_13] : memref<2x1xi32, #tpu.memory_space<vmem>>, vector<2x1xi32>
      %cst_14 = arith.constant dense<0xFF800000> : vector<2xf32>
      %16 = vector.multi_reduction <maximumf>, %14, %cst_14 [1] : vector<2x10xf32> to vector<2xf32>
      %17 = vector.shape_cast %16 : vector<2xf32> to vector<2x1xf32>
      %18 = vector.broadcast %17 : vector<2x1xf32> to vector<2x10xf32>
      %19 = arith.subf %14, %18 : vector<2x10xf32>
      %20 = math.exp %19 : vector<2x10xf32>
      %cst_15 = arith.constant dense<0.000000e+00> : vector<2xf32>
      %21 = vector.multi_reduction <add>, %20, %cst_15 [1] : vector<2x10xf32> to vector<2xf32>
      %22 = vector.shape_cast %21 : vector<2xf32> to vector<2x1xf32>
      %23 = math.log %22 : vector<2x1xf32>
      %24 = arith.addf %23, %17 : vector<2x1xf32>
      %25 = tpu.iota {dimensions = array<i32: 1>} : vector<2x10xi32>
      %26 = vector.broadcast %15 : vector<2x1xi32> to vector<2x10xi32>
      %27 = arith.cmpi eq, %25, %26 : vector<2x10xi32>
      %cst_16 = arith.constant 0.000000e+00 : f32
      %28 = vector.broadcast %cst_16 : f32 to vector<2x10xf32>
      %29 = arith.select %27, %14, %28 : vector<2x10xi1>, vector<2x10xf32>
      %cst_17 = arith.constant dense<0.000000e+00> : vector<2xf32>
      %30 = vector.multi_reduction <add>, %29, %cst_17 [1] : vector<2x10xf32> to vector<2xf32>
      %31 = vector.shape_cast %30 : vector<2xf32> to vector<2x1xf32>
      %32 = arith.subf %24, %31 : vector<2x1xf32>
      %33 = vector.shape_cast %32 : vector<2x1xf32> to vector<1x2x1xf32>
      %cst_18 = arith.constant dense<0.000000e+00> : vector<1xf32>
      %34 = vector.multi_reduction <add>, %33, %cst_18 [1, 2] : vector<1x2x1xf32> to vector<1xf32>
      %35 = vector.shape_cast %34 : vector<1xf32> to vector<1x1x1xf32>
      %36 = vector.extract %35[0, 0, 0] : f32 from vector<1x1x1xf32>
      %cst_19 = arith.constant 2.000000e+00 : f32
      %37 = arith.divf %36, %cst_19 : f32
      %38 = vector.broadcast %37 : f32 to vector<8x128xf32>
      %c0_20 = arith.constant 0 : index
      %c0_21 = arith.constant 0 : index
      %39 = vector.load %arg6[%c0_20, %c0_21] : memref<8x128xf32, #tpu.memory_space<vmem>>, vector<8x128xf32>
      tpu.vector_store %arg6[%c0_20, %c0_21], %38 {strides = array<i32>} : memref<8x128xf32, #tpu.memory_space<vmem>>, vector<8x128xf32>,
      %cst_22 = arith.constant 0.000000e+00 : f32
      %40 = vector.broadcast %cst_22 : f32 to vector<32x512xf32>
      %c0_23 = arith.constant 0 : index
      %c0_24 = arith.constant 0 : index
      %41 = vector.load %arg8[%c0_23, %c0_24] : memref<32x512xf32, #tpu.memory_space<vmem>>, vector<32x512xf32>
      tpu.vector_store %arg8[%c0_23, %c0_24], %40 {strides = array<i32>} : memref<32x512xf32, #tpu.memory_space<vmem>>, vector<32x512xf32>,
    } else {
    }
    %c0 = arith.constant 0 : index
    %c0_1 = arith.constant 0 : index
    %3 = vector.load %arg4[%c0, %c0_1] : memref<32x512xf32, #tpu.memory_space<vmem>>, vector<32x512xf32>
    %c0_2 = arith.constant 0 : index
    %c0_3 = arith.constant 0 : index
    %4 = vector.load %arg5[%c0_2, %c0_3] : memref<32x512xf32, #tpu.memory_space<vmem>>, vector<32x512xf32>
    %c0_4 = arith.constant 0 : index
    %c0_5 = arith.constant 0 : index
    %5 = vector.load %arg8[%c0_4, %c0_5] : memref<32x512xf32, #tpu.memory_space<vmem>>, vector<32x512xf32>
    %cst = arith.constant -1.700000e-01 : f32
    %6 = vector.broadcast %cst : f32 to vector<32x512xf32>
    %7 = arith.addf %4, %6 : vector<32x512xf32>
    %8 = arith.mulf %3, %7 : vector<32x512xf32>
    %9 = arith.addf %5, %8 : vector<32x512xf32>
    %c0_6 = arith.constant 0 : index
    %c0_7 = arith.constant 0 : index
    %10 = vector.load %arg8[%c0_6, %c0_7] : memref<32x512xf32, #tpu.memory_space<vmem>>, vector<32x512xf32>
    tpu.vector_store %arg8[%c0_6, %c0_7], %9 {strides = array<i32>} : memref<32x512xf32, #tpu.memory_space<vmem>>, vector<32x512xf32>,
    %c0_i32_8 = arith.constant 0 : i32
    %11 = arith.cmpi eq, %arg1, %c0_i32_8 : i32
    %12 = arith.extui %11 : i1 to i32
    %c0_i32_9 = arith.constant 0 : i32
    %13 = arith.cmpi ne, %12, %c0_i32_9 : i32
    scf.if %13 {
      %c0_10 = arith.constant 0 : index
      %c0_11 = arith.constant 0 : index
      %14 = vector.load %arg8[%c0_10, %c0_11] : memref<32x512xf32, #tpu.memory_space<vmem>>, vector<32x512xf32>
      %15 = vector.shape_cast %14 : vector<32x512xf32> to vector<1x32x512xf32>
      %cst_12 = arith.constant dense<0.000000e+00> : vector<1xf32>
      %16 = vector.multi_reduction <add>, %15, %cst_12 [1, 2] : vector<1x32x512xf32> to vector<1xf32>
      %17 = vector.shape_cast %16 : vector<1xf32> to vector<1x1x1xf32>
      %18 = vector.extract %17[0, 0, 0] : f32 from vector<1x1x1xf32>
      %19 = vector.broadcast %18 : f32 to vector<8x128xf32>
      %c0_13 = arith.constant 0 : index
      %c0_14 = arith.constant 0 : index
      %20 = vector.load %arg7[%c0_13, %c0_14] : memref<8x128xf32, #tpu.memory_space<vmem>>, vector<8x128xf32>
      tpu.vector_store %arg7[%c0_13, %c0_14], %19 {strides = array<i32>} : memref<8x128xf32, #tpu.memory_space<vmem>>, vector<8x128xf32>,
    } else {
    }
    return
  }
  func.func @transform_0(%arg0: i32, %arg1: i32) -> (i32, i32) {
    %c0_i32 = arith.constant 0 : i32
    %c0_i32_0 = arith.constant 0 : i32
    %c0_i32_1 = arith.constant 0 : i32
    return %c0_i32, %c0_i32_0 : i32, i32
  }
  func.func @transform_1(%arg0: i32, %arg1: i32) -> (i32, i32) {
    %c0_i32 = arith.constant 0 : i32
    %c0_i32_0 = arith.constant 0 : i32
    %c0_i32_1 = arith.constant 0 : i32
    return %c0_i32, %c0_i32_0 : i32, i32
  }
  func.func @transform_2(%arg0: i32, %arg1: i32) -> (i32, i32) {
    %c1_i32 = arith.constant 1 : i32
    %0 = arith.muli %arg0, %c1_i32 : i32
    %1 = arith.addi %0, %arg1 : i32
    %c0_i32 = arith.constant 0 : i32
    %c0_i32_0 = arith.constant 0 : i32
    return %1, %c0_i32 : i32, i32
  }
  func.func @transform_3(%arg0: i32, %arg1: i32) -> (i32, i32) {
    %c1_i32 = arith.constant 1 : i32
    %0 = arith.muli %arg0, %c1_i32 : i32
    %1 = arith.addi %0, %arg1 : i32
    %c0_i32 = arith.constant 0 : i32
    %c0_i32_0 = arith.constant 0 : i32
    return %1, %c0_i32 : i32, i32
  }
  func.func @transform_4(%arg0: i32, %arg1: i32) -> (i32, i32) {
    %c0_i32 = arith.constant 0 : i32
    %c0_i32_0 = arith.constant 0 : i32
    return %arg0, %c0_i32 : i32, i32
  }
  func.func @transform_5(%arg0: i32, %arg1: i32) -> (i32, i32) {
    %c0_i32 = arith.constant 0 : i32
    %c0_i32_0 = arith.constant 0 : i32
    return %arg0, %c0_i32 : i32, i32
  }
}

</mosaic_0001>

<bundles_post_ra>
// kernel: tpu_custom_call.1
= control target key start
LH: loop header
LB: loop body
LE: loop exit
PB: predicated region body
PF: predicated region fallthrough
CT: control target
= control target key end

     0   :  { %s1352_s0 = inlined_call_operand.vmem [shape: f32[2,10], index: 0, kind: input, shape index: {}]   ;;  %s1353_s1 = inlined_call_operand.vmem [shape: s32[2,1], index: 1, kind: input, shape index: {}]   ;;  %s1354_s2 = inlined_call_operand.hbm [shape: f32[64,512], index: 2, kind: input, shape index: {}]   ;;  %s1355_s3 = inlined_call_operand.hbm [shape: f32[64,512], index: 3, kind: input, shape index: {}]   ;;  %s1356_s4 = inlined_call_operand.hbm [shape: f32[16,128], index: 4, kind: output, shape index: {0}]   ;;  %s1357_s5 = inlined_call_operand.hbm [shape: f32[16,128], index: 5, kind: output, shape index: {1}]  }
   0x1   :  { %1361 = sst [smem:[#allocation15_spill]] %s1354_s2 }
   0x2   :  { %11 = vsyncpa [#allocation4], 0 }
   0x3   :  { %13 = vsyncpa [#allocation4 + $0x1], 0 }
   0x4   :  { %14 = vsyncpa [#allocation7], 0 }
   0x5   :  { %16 = vsyncpa [#allocation7 + $0x1], 0 }
   0x6   :  { %17 = vsyncpa [#allocation5], 0 }
   0x7   :  { %19 = vsyncpa [#allocation5 + $0x1], 0 }
   0x8   :  { %20 = vsyncpa [#allocation10], 0 }
   0x9   :  { %22 = vsyncpa [#allocation10 + $0x1], 0  ;;  %s1032_s18 = smov 0   ;;  %s1034_s19 = smov 0  }
   0xa   :  { %s1036_s20 = smov 0   ;;  %s1038_s21 = smov 0  }
   0xb   :  { %s1040_s22 = smov 0   ;;  %s1042_s23 = smov 0  }
   0xc LB: > { %s704_s24 = sadd.s32 4294967295, %s993_s23   ;;  %s705_s25 = sadd.s32 4294967294, %s993_s23   ;;  %s993_s23 = sphi %s1042_s23, %s28_s23   ;;  %s989_s22 = sphi %s1040_s22, %s1379_s22   ;;  %s985_s21 = sphi %s1038_s21, %s1378_s21   ;;  %s981_s20 = sphi %s1036_s20, %s1377_s20   ;;  %s977_s19 = sphi %s1034_s19, %s1376_s19   ;;  %s973_s18 = sphi %s1032_s18, %s1375_s18  }
   0xd   : > { %s40_s26 = sadd.s32 1, %s989_s22  ;;  %s91_s27 = sadd.s32 1, %s981_s20 }
   0xe   : > { %p42_p0 = scmp.ge.s32.totalorder %s40_s26, 2  ;;  %p98_p1 = scmp.ne.s32.totalorder %s981_s20, %s977_s19 }
   0xf   : > { %p99_p2 = scmp.eq.s32.totalorder %s993_s23, 0  ;;  %p104_p3 = scmp.ne.s32.totalorder %s977_s19, %s973_s18 }
  0x10   : > { %s1381_s26 = smov (%p42_p0, %s40_s26), 0  ;;  %p105_p5 = scmp.eq.s32.totalorder %s704_s24, 0 }
  0x11   : > { %p1073_p4 = por %p99_p2, %p98_p1  ;;  %s88_s29 = ssub.s32 %s989_s22, %s1381_s26 }
  0x12   : > { %p156_p6 = scmp.eq.s32.totalorder %s704_s24, 1  ;;  %p89_p7 = scmp.eq.s32.totalorder %s88_s29, 0 }
  0x13   : > { %p1079_p8 = por %p105_p5, %p104_p3  ;;  %p162_p10 = scmp.eq.s32.totalorder %s705_s25, 1 }
  0x14   : > { %p1083_p9 = por %p156_p6, %p98_p1  ;;  %p757_p13 = scmp.lt.s32.totalorder %s993_s23, 2 }
  0x15   : > { %s1363_s30 = scalar_select %p1079_p8, 1, 0 }
  0x16   : > { %s1364_s6 = scalar_select %p1083_p9, 1, 0 }
  0x17   : > { %s1088_s7 = scalar_select %p89_p7, %s981_s20, %s91_s27  }
  0x18   : > { %p1090_p11 = por %p162_p10, %p104_p3  ;;  %s1097_s9 = sand.u32 1, %s981_s20  }
  0x19   : > { %s708_s10 = sshll.u32 %s1097_s9, 7  ;;  %s728_s11 = sshll.u32 %s989_s22, 11 }
  0x1a   : > { %s1365_s8 = scalar_select %p1090_p11, 1, 0 }
  0x1b   : > { %s1366_s2 = sld [smem:[#allocation15_spill]]  ;;  %s218_s15 = scalar_lea.vmem [#allocation3], %s708_s10 }
  0x1c   : > { %s227_s16 = sshll.u32 %s218_s15, 4  ;;  %p1114_p0 = pnand %p757_p13, %p1073_p4  ;;  %s1110_s16 = int_to_ptr.vmem [resolvable:$true] %s227_s16 }
  0x1d   : > { %s215_s24 = scalar_lea.sflag [#allocation4], %s1097_s9 }
  0x1e   : > { %p817_p3 = pneg %p1114_p0 }
  0x21   : > { %s1106_s14 = scalar_lea.hbm %s1366_s2, %s728_s11  ;;  %s820_s28 = scalar_lea.hbm %s1366_s2, 4096 }
  0x22   : > { %s815_s25 = scalar_lea.hbm %s1106_s14, 2048  ;;  %p821_p4 = scmp.lt.u32.totalorder %s1106_s14, %s1366_s2 }
  0x23   : > { %p816_p2 = scmp.ne.s32.totalorder %s1106_s14, %s815_s25  ;;  %p822_p7 = scmp.lt.u32.totalorder %s820_s28, %s815_s25 }
  0x24   : > { %p824_p13 = scmp.lt.u32.totalorder %s815_s25, %s1106_s14 }
  0x25   : > { %p818_p5 = pnand %p817_p3, %p816_p2  ;;  %p823_p10 = por %p822_p7, %p821_p4 }
  0x27   : > { %p819_p6 = pneg %p818_p5  ;;  %p825_p12 = por %p824_p13, %p823_p10 }
  0x29   : > { %p826_p1 = pnand %p825_p12, %p819_p6 }
  0x2b   : > { %829 = shalt.err (!%p826_p1)
}
  0x2c   : > { %s830_s15 = scalar_lea.vmem %s1110_s16, 2048  ;;  %s995_s27 = smov [#allocation3]  }
  0x2d   : > { %p831_p2 = scmp.ne.s32.totalorder %s1110_s16, %s830_s15  ;;  %s835_s29 = sshll.u32 %s995_s27, 4  ;;  %s836_s29 = int_to_ptr.vmem [resolvable:$false] %s835_s29 }
  0x2e   : > { %s837_s12 = scalar_lea.vmem %s836_s29, 4096  ;;  %p838_p9 = scmp.lt.s32.totalorder %s1110_s16, %s836_s29 }
  0x2f   : > { %p833_p5 = pnand %p831_p2, %p817_p3  ;;  %p839_p4 = scmp.lt.s32.totalorder %s837_s12, %s830_s15 }
  0x31   : > { %p834_p11 = pneg %p833_p5  ;;  %p840_p7 = por %p839_p4, %p838_p9 }
  0x33   : > { %p841_p10 = pnand %p840_p7, %p834_p11 }
  0x35   : > { %844 = shalt.err (!%p841_p10)
}
  0x36   : > { %s1359_s25 = smov 512   ;;  %s997_s28 = smov 32  }
  0x37   : > { %746 = dma.hbm_to_vmem [thread:$0]  (!%p1114_p0), %s1106_s14, 2048, %s1110_s16, %s215_s24, %s1359_s25, %s1359_s25, %s997_s28  }
  0x38   : > { %p258_p9 = scmp.lt.s32.totalorder %s993_s23, 3  ;;  %s1156_s27 = scalar_lea.hbm %s1355_s3, %s728_s11 }
  0x39   : > { %p1368_p11 = scmp.ge.s32.totalorder %s993_s23, 1  ;;  %s241_s12 = scalar_lea.vmem [#allocation6], %s708_s10 }
  0x3a   : > { %s250_s2 = sshll.u32 %s241_s12, 4  ;;  %s238_s14 = scalar_lea.sflag [#allocation7], %s1097_s9  ;;  %s1166_s2 = int_to_ptr.vmem [resolvable:$true] %s250_s2 }
  0x3b   : > { %p1160_p12 = pnand %p1368_p11, %p258_p9  ;;  %s845_s16 = scalar_lea.hbm %s1156_s27, 2048 }
  0x3c   : > { %p846_p1 = scmp.ne.s32.totalorder %s1156_s27, %s845_s16  ;;  %s850_s13 = scalar_lea.hbm %s1355_s3, 4096 }
  0x3d   : > { %p851_p2 = scmp.lt.u32.totalorder %s1156_s27, %s1355_s3  ;;  %p852_p5 = scmp.lt.u32.totalorder %s850_s13, %s845_s16 }
  0x3e   : > { %p848_p6 = pnand %p846_p1, %p817_p3  ;;  %p854_p7 = scmp.lt.u32.totalorder %s845_s16, %s1156_s27 }
  0x3f   : > { %p853_p4 = por %p852_p5, %p851_p2 }
  0x40   : > { %p849_p13 = pneg %p848_p6 }
  0x41   : > { %p855_p10 = por %p854_p7, %p853_p4 }
  0x43   : > { %p856_p9 = pnand %p855_p10, %p849_p13 }
  0x45   : > { %859 = shalt.err (!%p856_p9)
}
  0x46   : > { %s860_s10 = scalar_lea.vmem %s1166_s2, 2048  ;;  %s998_s12 = smov [#allocation6]  }
  0x47   : > { %p861_p11 = scmp.ne.s32.totalorder %s1166_s2, %s860_s10  ;;  %s865_s11 = sshll.u32 %s998_s12, 4  ;;  %s866_s11 = int_to_ptr.vmem [resolvable:$false] %s865_s11 }
  0x48   : > { %s867_s25 = scalar_lea.vmem %s866_s11, 4096  ;;  %p868_p8 = scmp.lt.s32.totalorder %s1166_s2, %s866_s11 }
  0x49   : > { %p863_p1 = pnand %p861_p11, %p817_p3  ;;  %p869_p2 = scmp.lt.s32.totalorder %s867_s25, %s860_s10 }
  0x4b   : > { %p864_p6 = pneg %p863_p1  ;;  %p870_p5 = por %p869_p2, %p868_p8 }
  0x4d   : > { %p871_p4 = pnand %p870_p5, %p864_p6 }
  0x4f   : > { %874 = shalt.err (!%p871_p4)
}
  0x50   : > { %s1370_s16 = smov 512   ;;  %262 = sbr.rel (%p1160_p12) target bundleno = 660 (0x294), region = 36 }
  0x51   : > { %749 = dma.hbm_to_vmem [thread:$0]  (!%p1114_p0), %s1156_s27, 2048, %s1166_s2, %s238_s14, %s1370_s16, %s1370_s16, %s997_s28  }
  0x52   : > { %s1200_s24 = sand.u32 (!%p1160_p12), 1, %s977_s19   ;;  %p1371_p8 = scmp.ne.s32.totalorder (!%p1160_p12), %s1363_s30, 0 }
  0x53   : > { %s717_s13 = sshll.u32 (!%p1160_p12), %s1200_s24, 7  ;;  %s265_s15 = scalar_lea.sflag (!%p1160_p12), [#allocation4], %s1200_s24 }
  0x54   : > { %s1204_s17 = scalar_lea.vmem (!%p1160_p12), [#allocation3], %s717_s13 }
  0x57   : > { %956 = dma.done.wait (%p1371_p8), %s265_s15, 2048  }
  0x58   : > { %958 = vsyncadd (%p1371_p8), %s265_s15, 4294965248  ;;  %s274_s2 = scalar_lea.sflag [#allocation7], %s1200_s24  ;;  %s1211_s9 = scalar_lea.vmem [#allocation6], %s717_s13 }
  0x59   : > { %960 = dma.done.wait (%p1371_p8), %s274_s2, 2048  }
  0x5a   : > { %962 = vsyncadd (%p1371_p8), %s274_s2, 4294965248  ;;  %v999_v0 = vmov 0   ;;  %vm324_vm0 = vcmask 74752   ;;  %v322_v1 = vld [vmem:[%s1352_s0] sm:$0x3]  ;;  %v337_v7 = vlaneseq  ;;  %v397_v15 = vld [vmem:[%s1211_s9 + $0x8] sm:$0xff] }
  0x5b   : > { %810 = vset.pattern.permute.xlu0 %v999_v0  ;;  %v325_v2 = vsel %vm324_vm0, %v322_v1, -inf  ;;  %v323_v3 = vld [vmem:[%s1353_s1] sm:$0x3]  ;;  %v429_v17 = vadd.f32 -0.17, %v397_v15  ;;  %v381_v19 = vld [vmem:[%s1204_s17 + $0x8] sm:$0xff] }
  0x5c   : > { %326 = vmax.xlane.f32.xlu0 %v325_v2  ;;  %v338_v8 = vand.u32 127, %v337_v7  ;;  %v396_v14 = vld [vmem:[%s1211_s9] sm:$0xff]  ;;  %v398_v20 = vld [vmem:[%s1211_s9 + $0x10] sm:$0xff]  ;;  %v399_v25 = vld [vmem:[%s1211_s9 + $0x18] sm:$0xff]  ;;  %vm348_vm2 = vcmask 1024   ;;  %s719_s30 = sshll.u32 %s1200_s24, 3 }
  0x5d   : > { %v428_v16 = vadd.f32 -0.17, %v396_v14  ;;  %v380_v18 = vld [vmem:[%s1204_s17] sm:$0xff]  ;;  %v430_v21 = vadd.f32 -0.17, %v398_v20  ;;  %v445_v23 = vmul.f32 %v429_v17, %v381_v19  ;;  %v382_v24 = vld [vmem:[%s1204_s17 + $0x10] sm:$0xff] }
  0x5e   : > { %v431_v26 = vadd.f32 -0.17, %v399_v25  ;;  %v383_v29 = vld [vmem:[%s1204_s17 + $0x18] sm:$0xff]  ;;  %v400_v30 = vld [vmem:[%s1211_s9 + $0x20] sm:$0xff]  ;;  %v401_v35 = vld [vmem:[%s1211_s9 + $0x28] sm:$0xff]  ;;  %s723_s10 = sshll.u32 %s985_s21, 7 }
  0x5f   : > { %v444_v22 = vmul.f32 %v428_v16, %v380_v18  ;;  %v446_v27 = vmul.f32 %v430_v21, %v382_v24  ;;  %v432_v31 = vadd.f32 -0.17, %v400_v30  ;;  %v384_v34 = vld [vmem:[%s1204_s17 + $0x20] sm:$0xff]  ;;  %v433_v36 = vadd.f32 -0.17, %v401_v35  ;;  %v385_v39 = vld [vmem:[%s1204_s17 + $0x28] sm:$0xff]  ;;  %s1281_s29 = scalar_lea.hbm %s1357_s5, %s723_s10 }
  0x60   : > { %v447_v32 = vmul.f32 %v431_v26, %v383_v29  ;;  %v402_v40 = vld [vmem:[%s1211_s9 + $0x30] sm:$0xff]  ;;  %v403_v45 = vld [vmem:[%s1211_s9 + $0x38] sm:$0xff]  ;;  %v404_v50 = vld [vmem:[%s1211_s9 + $0x40] sm:$0xff]  ;;  %s306_s12 = scalar_lea.vmem [#allocation8], %s719_s30  ;;  %s1264_s16 = scalar_lea.vmem [#allocation9], %s719_s30 }
  0x61   : > { %v511_v28 = vadd.f32 %v445_v23, %v444_v22  ;;  %v448_v37 = vmul.f32 %v432_v31, %v384_v34  ;;  %v434_v41 = vadd.f32 -0.17, %v402_v40  ;;  %v449_v42 = vmul.f32 %v433_v36, %v385_v39  ;;  %v386_v44 = vld [vmem:[%s1204_s17 + $0x30] sm:$0xff]  ;;  %v387_v49 = vld [vmem:[%s1204_s17 + $0x38] sm:$0xff]  ;;  %v388_v54 = vld [vmem:[%s1204_s17 + $0x40] sm:$0xff]  ;;  %s556_s11 = sshll.u32 %s306_s12, 4  ;;  %s1272_s11 = int_to_ptr.vmem [resolvable:$true] %s556_s11 }
  0x62   : > { %v435_v46 = vadd.f32 -0.17, %v403_v45  ;;  %v436_v51 = vadd.f32 -0.17, %v404_v50  ;;  %v405_v55 = vld [vmem:[%s1211_s9 + $0x48] sm:$0xff]  ;;  %v406_v60 = vld [vmem:[%s1211_s9 + $0x50] sm:$0xff] }
  0x63   : > { %v512_v33 = vadd.f32 %v511_v28, %v446_v27  ;;  %v450_v47 = vmul.f32 %v434_v41, %v386_v44  ;;  %v437_v56 = vadd.f32 -0.17, %v405_v55  ;;  %v389_v59 = vld [vmem:[%s1204_s17 + $0x48] sm:$0xff]  ;;  %v438_v61 = vadd.f32 -0.17, %v406_v60  ;;  %v390_v0 = vld [vmem:[%s1204_s17 + $0x50] sm:$0xff] }
  0x64   : > { %v451_v52 = vmul.f32 %v435_v46, %v387_v49  ;;  %v452_v57 = vmul.f32 %v436_v51, %v388_v54  ;;  %v408_v7 = vld [vmem:[%s1211_s9 + $0x60] sm:$0xff]  ;;  %v393_v17 = vld [vmem:[%s1204_s17 + $0x68] sm:$0xff]  ;;  %v410_v18 = vld [vmem:[%s1211_s9 + $0x70] sm:$0xff]  ;;  %s569_s13 = sshll.u32 %s1264_s16, 4  ;;  %s538_s14 = scalar_lea.sflag [#allocation5], %s1200_s24  ;;  %s1274_s13 = int_to_ptr.vmem [resolvable:$true] %s569_s13 }
  0x65   : > { %v513_v38 = vadd.f32 %v512_v33, %v447_v32  ;;  %v453_v62 = vmul.f32 %v437_v56, %v389_v59  ;;  %v442_v19 = vadd.f32 -0.17, %v410_v18  ;;  %v394_v22 = vld [vmem:[%s1204_s17 + $0x70] sm:$0xff]  ;;  %v411_v23 = vld [vmem:[%s1211_s9 + $0x78] sm:$0xff]  ;;  %s875_s30 = scalar_lea.vmem %s1272_s11, 128  ;;  %p1372_p3 = scmp.ne.s32.totalorder %s1364_s6, 0 }
  0x66   : > { %v443_v25 = vadd.f32 -0.17, %v411_v23  ;;  %v395_v29 = vld [vmem:[%s1204_s17 + $0x78] sm:$0xff]  ;;  %p876_p0 = scmp.ne.s32.totalorder %s1272_s11, %s875_s30 }
  0x67   : > { %v514_v43 = vadd.f32 %v513_v38, %v448_v37  ;;  %v458_v26 = vmul.f32 %v442_v19, %v394_v22 }
  0x68   : > { %v459_v32 = vmul.f32 %v443_v25, %v395_v29  ;;  %p877_p12 = pnand %p876_p0, %p1372_p3 }
  0x69   : > { %v515_v48 = vadd.f32 %v514_v43, %v449_v42 }
  0x6a   : > { %p878_p13 = pneg %p877_p12 }
  0x6b   : > { %v516_v53 = vadd.f32 %v515_v48, %v450_v47 }
  0x6d   : > { %v517_v58 = vadd.f32 %v516_v53, %v451_v52 }
  0x6f   : > { %v518_v63 = vadd.f32 %v517_v58, %v452_v57 }
  0x72   : > { %340 = vperm.xlu0 %810, %v323_v3   ;;  %v454_v3 = vmul.f32 %v438_v61, %v390_v0 }
  0xe9   : > { %v1224_v4 = vpop.xlane.xlu0 %326 }
  0xea   : > { %v328_v5 = vsub.f32 %v322_v1, %v1224_v4 }
  0xec   : > { %v329_v6 = vmul.f32 1.442695, %v328_v5  ;;  %v519_v5 = vadd.f32 %v518_v63, %v453_v62 }
  0xee   : > { %811 = vpow2.f32 %v329_v6  ;;  %v391_v6 = vld [vmem:[%s1204_s17 + $0x58] sm:$0xff] }
  0xf1   : > { %v341_v9 = vpop.permute.xlu0 %340 }
  0xf2   : > { %vm342_vm1 = vcmp.eq.s32.totalorder %v338_v8, %v341_v9  ;;  %v440_v8 = vadd.f32 -0.17, %v408_v7 }
  0xf3   : > { %v343_v11 = vsel %vm342_vm1, %v322_v1, 0.0  ;;  %v407_v1 = vld [vmem:[%s1211_s9 + $0x58] sm:$0xff] }
  0xf4   : > { %v344_v13 = vsel %vm324_vm0, %v343_v11, 0.0  ;;  %v439_v2 = vadd.f32 -0.17, %v407_v1 }
  0xf6   : > { %v455_v9 = vmul.f32 %v439_v2, %v391_v6 }
  0xf8   : > { %v812_v10 = vpop.eup %811 }
  0xf9   : > { %v331_v12 = vsel %vm324_vm0, %v812_v10, 0.0  ;;  %v520_v10 = vadd.f32 %v519_v5, %v454_v3 }
  0xfa   : > { %332 = vadd.xlane.f32.xlu1 %v331_v12  ;;  %v392_v12 = vld [vmem:[%s1204_s17 + $0x60] sm:$0xff] }
  0xfb   : > { %v456_v15 = vmul.f32 %v440_v8, %v392_v12  ;;  %v521_v16 = vadd.f32 %v520_v10, %v455_v9 }
  0xfd   : > { %v522_v21 = vadd.f32 %v521_v16, %v456_v15 }
  0xfe   : > { %345 = vadd.xlane.f32.xlu1 %v344_v13  ;;  %v409_v13 = vld [vmem:[%s1211_s9 + $0x68] sm:$0xff]  ;;  %s1270_s9 = scalar_lea.hbm %s1356_s4, %s723_s10 }
  0xff   : > { %v441_v14 = vadd.f32 -0.17, %v409_v13 }
 0x101   : > { %v457_v20 = vmul.f32 %v441_v14, %v393_v17 }
 0x103   : > { %v523_v27 = vadd.f32 %v522_v21, %v457_v20 }
 0x105   : > { %v524_v33 = vadd.f32 %v523_v27, %v458_v26 }
 0x107   : > { %v525_v36 = vadd.f32 %v524_v33, %v459_v32 }
 0x187   : > { %v333_v11 = vpop.xlane.xlu1 %332 }
 0x188   : > { %813 = vlog2.f32 %v333_v11 }
 0x18b   : > { %v346_v30 = vpop.xlane.xlu1 %345 }
 0x192   : > { %v814_v24 = vpop.eup %813 }
 0x193   : > { %v335_v28 = vmul.f32 0.6931472, %v814_v24 }
 0x195   : > { %v336_v31 = vadd.f32 %v335_v28, %v1224_v4 }
 0x197   : > { %v347_v34 = vsub.f32 %v336_v31, %v346_v30 }
 0x199   : > { %v349_v35 = vsel %vm348_vm2, %v347_v34, 0.0 }
 0x19a   : > { %350 = vadd.xlane.f32.xlu1 %v349_v35 }
 0x19e   : > { %526 = vadd.xlane.f32.xlu1 %v525_v36 }
 0x227   : > { %v351_v37 = vpop.xlane.xlu1 %350 }
 0x228   : > { %v352_v38 = vrot.slane %v351_v37, 4 }
 0x22a   : > { %v353_v39 = vadd.f32 %v352_v38, %v351_v37 }
 0x22b   : > { %v527_v40 = vpop.xlane.xlu1 %526 }
 0x22c   : > { %v354_v41 = vrot.slane %v353_v39, 2  ;;  %v528_v42 = vrot.slane %v527_v40, 4 }
 0x22e   : > { %v529_v43 = vadd.f32 %v528_v42, %v527_v40  ;;  %v355_v44 = vadd.f32 %v354_v41, %v353_v39 }
 0x230   : > { %v530_v45 = vrot.slane %v529_v43, 2  ;;  %v356_v4 = vrot.slane %v355_v44, 1 }
 0x232   : > { %v531_v46 = vadd.f32 %v530_v45, %v529_v43  ;;  %v357_v47 = vadd.f32 %v356_v4, %v355_v44 }
 0x234   : > { %731 = vpush %v357_v47  ;;  %v532_v48 = vrot.slane %v531_v46, 1 }
 0x236   : > { %v533_v49 = vadd.f32 %v532_v48, %v531_v46 }
 0x238   : > { %733 = vpush %v533_v49 }
 0x265   : > { %s732_s25 = spop %731 }
 0x266   : > { %s361_s15 = smul.f32 0.5, %s732_s25  ;;  %s1000_s25 = smov [#allocation8]  }
 0x268   : > { %v362_v50 = vstv %s361_s15  ;;  %s879_s15 = sshll.u32 %s1000_s25, 4  ;;  %s880_s15 = int_to_ptr.vmem [resolvable:$false] %s879_s15 }
 0x269   : > { %363 = vst [vmem:[%s306_s12] sm:$0xff] %v362_v50  ;;  %s1276_s21 = spop %733  ;;  %s881_s17 = scalar_lea.vmem %s880_s15, 256 }
 0x26a   : > { %v535_v51 = vstv %s1276_s21  ;;  %p882_p7 = scmp.lt.s32.totalorder %s1272_s11, %s880_s15  ;;  %p883_p10 = scmp.lt.s32.totalorder %s881_s17, %s875_s30 }
 0x26c   : > { %p884_p9 = por %p883_p10, %p882_p7 }
 0x26e   : > { %p885_p11 = pnand %p884_p9, %p878_p13 }
 0x270   : > { %888 = shalt.err (!%p885_p11)
}
 0x271   : > { %s889_s10 = scalar_lea.hbm %s1270_s9, 128  ;;  %s893_s21 = scalar_lea.hbm %s1356_s4, 256 }
 0x272   : > { %p890_p1 = scmp.ne.s32.totalorder %s1270_s9, %s889_s10  ;;  %p894_p5 = scmp.lt.u32.totalorder %s1270_s9, %s1356_s4 }
 0x273   : > { %p895_p4 = scmp.lt.u32.totalorder %s893_s21, %s889_s10  ;;  %p897_p0 = scmp.lt.u32.totalorder %s889_s10, %s1270_s9 }
 0x274   : > { %p891_p6 = pnand %p890_p1, %p1372_p3 }
 0x275   : > { %p896_p8 = por %p895_p4, %p894_p5 }
 0x276   : > { %p892_p2 = pneg %p891_p6 }
 0x277   : > { %p898_p12 = por %p897_p0, %p896_p8 }
 0x279   : > { %p899_p13 = pnand %p898_p12, %p892_p2 }
 0x27b   : > { %902 = shalt.err (!%p899_p13)
}
 0x27c   : > { %739 = dma.vmem_to_hbm [thread:$0]  (%p1372_p3), %s1272_s11, 128, %s1270_s9, %s538_s14   ;;  %536 = vst [vmem:[%s1264_s16] sm:$0xff] %v535_v51 }
 0x27d   : > { %s543_s30 = scalar_lea.sflag [#allocation10], %s1200_s24  ;;  %s903_s25 = scalar_lea.vmem %s1274_s13, 128 }
 0x27e   : > { %p904_p7 = scmp.ne.s32.totalorder %s1274_s13, %s903_s25  ;;  %s1001_s15 = smov [#allocation9]  }
 0x27f   : > { %s907_s17 = sshll.u32 %s1001_s15, 4  ;;  %s908_s17 = int_to_ptr.vmem [resolvable:$false] %s907_s17 }
 0x280   : > { %p905_p10 = pnand %p904_p7, %p1372_p3  ;;  %s909_s10 = scalar_lea.vmem %s908_s17, 256 }
 0x281   : > { %p910_p11 = scmp.lt.s32.totalorder %s1274_s13, %s908_s17  ;;  %p911_p1 = scmp.lt.s32.totalorder %s909_s10, %s903_s25 }
 0x282   : > { %p906_p9 = pneg %p905_p10 }
 0x283   : > { %p912_p6 = por %p911_p1, %p910_p11 }
 0x285   : > { %p913_p2 = pnand %p912_p6, %p906_p9 }
 0x287   : > { %916 = shalt.err (!%p913_p2)
}
 0x288   : > { %s917_s24 = scalar_lea.hbm %s1281_s29, 128  ;;  %s921_s9 = scalar_lea.hbm %s1357_s5, 256 }
 0x289   : > { %p918_p5 = scmp.ne.s32.totalorder %s1281_s29, %s917_s24  ;;  %p922_p0 = scmp.lt.u32.totalorder %s1281_s29, %s1357_s5 }
 0x28a   : > { %p923_p12 = scmp.lt.u32.totalorder %s921_s9, %s917_s24  ;;  %p925_p7 = scmp.lt.u32.totalorder %s917_s24, %s1281_s29 }
 0x28b   : > { %p919_p4 = pnand %p918_p5, %p1372_p3 }
 0x28c   : > { %p924_p13 = por %p923_p12, %p922_p0 }
 0x28d   : > { %p920_p8 = pneg %p919_p4 }
 0x28e   : > { %p926_p10 = por %p925_p7, %p924_p13 }
 0x290   : > { %p927_p9 = pnand %p926_p10, %p920_p8 }
 0x292   : > { %930 = shalt.err (!%p927_p9)
}
 0x293   : > { %740 = dma.vmem_to_hbm [thread:$0]  (%p1372_p3), %s1274_s13, 128, %s1281_s29, %s543_s30  }
 0x294 PF: > { %s581_s2 = sand.u32 1, %s973_s18   ;;  %p1373_p11 = scmp.ne.s32.totalorder %s1365_s8, 0 }
 0x295   : > { %p1374_p1 = scmp.ge.s32.totalorder %s993_s23, 2  ;;  %s582_s21 = scalar_lea.sflag [#allocation5], %s581_s2 }
 0x297   : > { %p751_p6 = pnand %p1374_p1, %p1373_p11 }
 0x299   : > { %964 = dma.done.wait (!%p751_p6), %s582_s21, 128  }
 0x29a   : > { %966 = vsyncadd (!%p751_p6), %s582_s21, 4294967168  ;;  %s591_s28 = scalar_lea.sflag [#allocation10], %s581_s2 }
 0x29b   : > { %968 = dma.done.wait (!%p751_p6), %s591_s28, 128  }
 0x29c   : > { %970 = vsyncadd (!%p751_p6), %s591_s28, 4294967168  ;;  %s28_s23 = sadd.s32 1, %s993_s23   ;;  %s1375_s18 = smov %s977_s19 }
 0x29d   : > { %p25_p2 = scmp.ge.s32.totalorder %s28_s23, 4   ;;  %s1376_s19 = smov %s981_s20 }
 0x29e   : > { %s1377_s20 = smov %s1088_s7  ;;  %s1378_s21 = smov %s989_s22 }
 0x29f   : > { %s1379_s22 = smov %s1381_s26  ;;  %27 = sbr.rel (!%p25_p2) target bundleno = 12 (0xc), region = 119 }
 0x2a6   :  { %596 = vsyncpa [#allocation4], 1 }
 0x2a7   :  { %598 = vsyncpa [#allocation4 + $0x1], 1 }
 0x2a8   :  { %599 = vsyncpa [#allocation7], 1 }
 0x2a9   :  { %601 = vsyncpa [#allocation7 + $0x1], 1 }
 0x2aa   :  { %602 = vsyncpa [#allocation5], 1 }
 0x2ab   :  { %604 = vsyncpa [#allocation5 + $0x1], 1 }
 0x2ac   :  { %605 = vsyncpa [#allocation10], 1 }
 0x2ad   :  { %607 = vsyncpa [#allocation10 + $0x1], 1 }

</bundles_post_ra>
